<compile_context>
chip_gen: v7x
topology: tpu7x:2x2x1
jax: 0.10.0
libtpu: 0.0.40
codegen_flags: <defaults>
</compile_context>

<pallas_src>
import functools
import math

import jax
import jax.numpy as jnp
from jax import lax
from jax.experimental import pallas as pl
from jax.experimental.pallas import tpu as pltpu

TRAIN_FDR = 0.01   # constants.train_fdr
EPSILON = 1e-7     # constants.epsilon

LANES = 128
SUBLANES = 8


def _layout(b, n_sources):
    """Pick padded row count and row-block size for the lane-dense layout."""
    rows = -(-b // LANES)
    rows = -(-rows // SUBLANES) * SUBLANES
    # VMEM budget for kernel 1: (2 inputs + n_sources source planes + 2 outputs)
    # f32 blocks, double-buffered -> keep under ~8 MiB (fits v7x scoped VMEM).
    budget_rows = (8 * 1024 * 1024) // ((n_sources + 4) * LANES * 4 * 2)
    max_block = max(SUBLANES, min(512, (budget_rows // SUBLANES) * SUBLANES))
    if rows >= max_block:
        block_rows = max_block
    elif rows >= 64:
        block_rows = 64
    else:
        block_rows = SUBLANES
    rows = -(-rows // block_rows) * block_rows
    return rows, block_rows


def _elementwise_kernel(w_ref, pred_ref, true_ref, src_ref,
                        norm_ref, negl_ref, *, eps, n_sources):
    """Fused linear(source) + clamp + abs-error / + log -> norm, neg_logL."""
    abs_err = jnp.abs(pred_ref[...] - true_ref[...])            # (br, 128)
    # source_b(source): S-way scalar*vector MAC (weight lives in SMEM).
    exp_abs = w_ref[0] * src_ref[0]
    for s in range(1, n_sources):
        exp_abs = exp_abs + w_ref[s] * src_ref[s]
    exp_abs = jnp.maximum(exp_abs, eps)                         # .clamp(eps)
    norm = abs_err / exp_abs
    norm_ref[...] = norm
    negl_ref[...] = norm + jnp.log(2.0 * exp_abs)


def _reduce_kernel(loc_ref, norm_ref, negl_ref, out_ref, acc_ref,
                   *, fdr, eps, n_valid, block_rows):
    """Two-pass streaming reduction.

    pass p==0: accumulate sum|norm - loc| (Laplace MLE scale numerator) and
               compute the ppf threshold at the last block.
    pass p==1: accumulate sum(negl * mask) and sum(mask), finalize the loss.
    Padded elements are excluded via an iota-derived valid mask.
    """
    p = pl.program_id(0)        # pass index
    j = pl.program_id(1)        # row-block index
    nb = pl.num_programs(1)

    row_ids = lax.broadcasted_iota(jnp.int32, (block_rows, LANES), 0)
    lane_ids = lax.broadcasted_iota(jnp.int32, (block_rows, LANES), 1)
    flat_idx = (j * block_rows + row_ids) * LANES + lane_ids
    valid = flat_idx < n_valid

    norm = norm_ref[...]

    @pl.when((p == 0) & (j == 0))
    def _init():
        acc_ref[...] = jnp.zeros_like(acc_ref)

    @pl.when(p == 0)
    def _pass0():
        loc = loc_ref[0]
        dev = jnp.where(valid, jnp.abs(norm - loc), 0.0)
        acc_ref[0] += jnp.sum(dev)

    @pl.when((p == 0) & (j == nb - 1))
    def _threshold():
        loc = loc_ref[0]
        scale = acc_ref[0] / float(n_valid)      # mean |x - median| over valid
        q = 1.0 - fdr                            # fdr is a compile-time const
        if q >= 0.5:
            acc_ref[3] = loc - scale * math.log(2.0 * (1.0 - q))
        else:
            acc_ref[3] = loc + scale * math.log(2.0 * q)

    @pl.when(p == 1)
    def _pass1():
        threshold = acc_ref[3]
        mask = ((norm < threshold) & valid).astype(jnp.float32)
        acc_ref[1] += jnp.sum(negl_ref[...] * mask)
        acc_ref[2] += jnp.sum(mask)

    @pl.when((p == 1) & (j == nb - 1))
    def _finalize():
        out_ref[0] = (acc_ref[1] + eps) / (acc_ref[2] + eps)


def rt_masked_neg_logl(pred, true, source, weight, fdr=TRAIN_FDR, eps=EPSILON):
    pred = jnp.asarray(pred, jnp.float32).reshape(-1)      # (B,)
    true = jnp.asarray(true, jnp.float32).reshape(-1)      # (B,)
    source = jnp.asarray(source, jnp.float32)              # (B, S)
    weight = jnp.asarray(weight, jnp.float32).reshape(-1)  # (S,)

    b = pred.shape[0]
    s = source.shape[-1]
    rows, block_rows = _layout(b, s)
    padded = rows * LANES
    n_blocks = rows // block_rows

    def to_lane_dense(x):                                   # (B,) -> (rows, 128)
        return jnp.pad(x, (0, padded - b)).reshape(rows, LANES)

    pred2 = to_lane_dense(pred)
    true2 = to_lane_dense(true)
    # (B, S) -> (S, rows, 128): per-source lane-dense planes.
    src_t = jnp.pad(source.T, ((0, 0), (0, padded - b))).reshape(s, rows, LANES)

    norm, negl = pl.pallas_call(
        functools.partial(_elementwise_kernel, eps=eps, n_sources=s),
        grid=(n_blocks,),
        in_specs=[
            pl.BlockSpec(memory_space=pltpu.MemorySpace.SMEM),            # weight
            pl.BlockSpec((block_rows, LANES), lambda i: (i, 0)),          # pred
            pl.BlockSpec((block_rows, LANES), lambda i: (i, 0)),          # true
            pl.BlockSpec((s, block_rows, LANES), lambda i: (0, i, 0)),    # source
        ],
        out_specs=(
            pl.BlockSpec((block_rows, LANES), lambda i: (i, 0)),          # norm
            pl.BlockSpec((block_rows, LANES), lambda i: (i, 0)),          # negl
        ),
        out_shape=(
            jax.ShapeDtypeStruct((rows, LANES), jnp.float32),
            jax.ShapeDtypeStruct((rows, LANES), jnp.float32),
        ),
        compiler_params=pltpu.CompilerParams(
            dimension_semantics=("parallel",)),
    )(weight, pred2, true2, src_t)

    # TODO(synk): median (sort/selection) for the Laplace fit has no clean
    # Pallas equivalent; computed with jnp.median over the valid entries only.
    loc = jnp.median(norm.reshape(-1)[:b]).reshape((1,)).astype(jnp.float32)

    out = pl.pallas_call(
        functools.partial(_reduce_kernel, fdr=fdr, eps=eps, n_valid=b,
                          block_rows=block_rows),
        grid=(2, n_blocks),
        in_specs=[
            pl.BlockSpec(memory_space=pltpu.MemorySpace.SMEM),            # loc
            pl.BlockSpec((block_rows, LANES), lambda p, j: (j, 0)),       # norm
            # negl is only needed in pass 1; pin it to block 0 during pass 0
            # so it is streamed from HBM exactly once.
            pl.BlockSpec((block_rows, LANES), lambda p, j: (p * j, 0)),   # negl
        ],
        out_specs=pl.BlockSpec(memory_space=pltpu.MemorySpace.SMEM),
        out_shape=jax.ShapeDtypeStruct((1,), jnp.float32),
        scratch_shapes=[pltpu.SMEM((4,), jnp.float32)],
        compiler_params=pltpu.CompilerParams(
            dimension_semantics=("arbitrary", "arbitrary")),
    )(loc, norm, negl)
    return out[0]


def reference(pred, true, source, weight, fdr=TRAIN_FDR, eps=EPSILON):
    abs_error = jnp.abs(pred - true)
    exp_abs = jnp.maximum(source @ weight.T, eps)
    norm = abs_error / exp_abs
    negl = norm + jnp.log(2.0 * exp_abs)
    loc = jnp.median(norm)
    scale = jnp.mean(jnp.abs(norm - loc))
    threshold = loc - scale * jnp.log(2.0 * fdr)   # q = 1 - fdr > 0.5
    mask = (norm < threshold).astype(jnp.float32)
    return (jnp.sum(negl * mask) + eps) / (jnp.sum(mask) + eps)


if __name__ == "__main__":
    B, N_SOURCES = 2051, 4   # odd, non-multiple of 128 -> exercises padding + multi-block grid
    key = jax.random.PRNGKey(0)
    k1, k2, k3 = jax.random.split(key, 3)

    pred = jax.random.normal(k1, (B, 1), dtype=jnp.float32)
    true = jax.random.normal(k2, (B, 1), dtype=jnp.float32)
    src_idx = jax.random.randint(k3, (B,), 0, N_SOURCES)
    source = jax.nn.one_hot(src_idx, N_SOURCES, dtype=jnp.float32)
    # nn.Linear(n_sources, 1, bias=False) with nn.init.constant_(weight, 10.0)
    weight = jnp.full((1, N_SOURCES), 10.0, dtype=jnp.float32)

    out = rt_masked_neg_logl(pred, true, source, weight)
    out = jax.block_until_ready(out)

    ref = reference(pred, true, source, weight)
    assert abs(float(out) - float(ref)) < 1e-5 * max(1.0, abs(float(ref))), (
        f"mismatch: kernel={float(out)} ref={float(ref)}")

    print("KERNEL_OK")
</pallas_src>

<mosaic_0001>
module attributes {stable_mosaic.version = 11 : i64} {
  func.func @_elementwise_kernel(%arg0: i32, %arg1: memref<4xf32, #tpu.memory_space<smem>>, %arg2: memref<8x128xf32, #tpu.memory_space<vmem>>, %arg3: memref<8x128xf32, #tpu.memory_space<vmem>>, %arg4: memref<4x8x128xf32, #tpu.memory_space<vmem>>, %arg5: memref<8x128xf32, #tpu.memory_space<vmem>>, %arg6: memref<8x128xf32, #tpu.memory_space<vmem>>) attributes {dimension_semantics = [#tpu.dimension_semantics<parallel>], iteration_bounds = array<i64: 3>, scalar_prefetch = 0 : i64, scratch_operands = 0 : i64, tpu.core_type = #tpu.core_type<tc>, window_params = [{transform_indices = @transform_0, window_bounds = array<i64: 4>}, {transform_indices = @transform_1, window_bounds = array<i64: 8, 128>}, {transform_indices = @transform_2, window_bounds = array<i64: 8, 128>}, {transform_indices = @transform_3, window_bounds = array<i64: 4, 8, 128>}, {transform_indices = @transform_4, window_bounds = array<i64: 8, 128>}, {transform_indices = @transform_5, window_bounds = array<i64: 8, 128>}]} {
    %c0 = arith.constant 0 : index
    %c0_0 = arith.constant 0 : index
    %0 = vector.load %arg2[%c0, %c0_0] : memref<8x128xf32, #tpu.memory_space<vmem>>, vector<8x128xf32>
    %c0_1 = arith.constant 0 : index
    %c0_2 = arith.constant 0 : index
    %1 = vector.load %arg3[%c0_1, %c0_2] : memref<8x128xf32, #tpu.memory_space<vmem>>, vector<8x128xf32>
    %2 = arith.subf %0, %1 : vector<8x128xf32>
    %3 = math.absf %2 : vector<8x128xf32>
    %c0_3 = arith.constant 0 : index
    %4 = memref.load %arg1[%c0_3] : memref<4xf32, #tpu.memory_space<smem>>
    %c0_4 = arith.constant 0 : index
    %c0_5 = arith.constant 0 : index
    %c0_6 = arith.constant 0 : index
    %5 = vector.load %arg4[%c0_4, %c0_5, %c0_6] : memref<4x8x128xf32, #tpu.memory_space<vmem>>, vector<1x8x128xf32>
    %6 = vector.shape_cast %5 : vector<1x8x128xf32> to vector<8x128xf32>
    %7 = vector.broadcast %4 : f32 to vector<8x128xf32>
    %8 = arith.mulf %7, %6 : vector<8x128xf32>
    %c1 = arith.constant 1 : index
    %9 = memref.load %arg1[%c1] : memref<4xf32, #tpu.memory_space<smem>>
    %c1_7 = arith.constant 1 : index
    %c0_8 = arith.constant 0 : index
    %c0_9 = arith.constant 0 : index
    %10 = vector.load %arg4[%c1_7, %c0_8, %c0_9] : memref<4x8x128xf32, #tpu.memory_space<vmem>>, vector<1x8x128xf32>
    %11 = vector.shape_cast %10 : vector<1x8x128xf32> to vector<8x128xf32>
    %12 = vector.broadcast %9 : f32 to vector<8x128xf32>
    %13 = arith.mulf %12, %11 : vector<8x128xf32>
    %14 = arith.addf %8, %13 : vector<8x128xf32>
    %c2 = arith.constant 2 : index
    %15 = memref.load %arg1[%c2] : memref<4xf32, #tpu.memory_space<smem>>
    %c2_10 = arith.constant 2 : index
    %c0_11 = arith.constant 0 : index
    %c0_12 = arith.constant 0 : index
    %16 = vector.load %arg4[%c2_10, %c0_11, %c0_12] : memref<4x8x128xf32, #tpu.memory_space<vmem>>, vector<1x8x128xf32>
    %17 = vector.shape_cast %16 : vector<1x8x128xf32> to vector<8x128xf32>
    %18 = vector.broadcast %15 : f32 to vector<8x128xf32>
    %19 = arith.mulf %18, %17 : vector<8x128xf32>
    %20 = arith.addf %14, %19 : vector<8x128xf32>
    %c3 = arith.constant 3 : index
    %21 = memref.load %arg1[%c3] : memref<4xf32, #tpu.memory_space<smem>>
    %c3_13 = arith.constant 3 : index
    %c0_14 = arith.constant 0 : index
    %c0_15 = arith.constant 0 : index
    %22 = vector.load %arg4[%c3_13, %c0_14, %c0_15] : memref<4x8x128xf32, #tpu.memory_space<vmem>>, vector<1x8x128xf32>
    %23 = vector.shape_cast %22 : vector<1x8x128xf32> to vector<8x128xf32>
    %24 = vector.broadcast %21 : f32 to vector<8x128xf32>
    %25 = arith.mulf %24, %23 : vector<8x128xf32>
    %26 = arith.addf %20, %25 : vector<8x128xf32>
    %cst = arith.constant 1.000000e-07 : f32
    %27 = vector.broadcast %cst : f32 to vector<8x128xf32>
    %28 = arith.maximumf %26, %27 : vector<8x128xf32>
    %29 = arith.divf %3, %28 : vector<8x128xf32>
    %c0_16 = arith.constant 0 : index
    %c0_17 = arith.constant 0 : index
    %30 = vector.load %arg5[%c0_16, %c0_17] : memref<8x128xf32, #tpu.memory_space<vmem>>, vector<8x128xf32>
    tpu.vector_store %arg5[%c0_16, %c0_17], %29 {strides = array<i32>} : memref<8x128xf32, #tpu.memory_space<vmem>>, vector<8x128xf32>,
    %cst_18 = arith.constant 2.000000e+00 : f32
    %31 = vector.broadcast %cst_18 : f32 to vector<8x128xf32>
    %32 = arith.mulf %31, %28 : vector<8x128xf32>
    %33 = math.log %32 : vector<8x128xf32>
    %34 = arith.addf %29, %33 : vector<8x128xf32>
    %c0_19 = arith.constant 0 : index
    %c0_20 = arith.constant 0 : index
    %35 = vector.load %arg6[%c0_19, %c0_20] : memref<8x128xf32, #tpu.memory_space<vmem>>, vector<8x128xf32>
    tpu.vector_store %arg6[%c0_19, %c0_20], %34 {strides = array<i32>} : memref<8x128xf32, #tpu.memory_space<vmem>>, vector<8x128xf32>,
    return
  }
  func.func @transform_0(%arg0: i32) -> i32 {
    %c0_i32 = arith.constant 0 : i32
    %c0_i32_0 = arith.constant 0 : i32
    return %c0_i32 : i32
  }
  func.func @transform_1(%arg0: i32) -> (i32, i32) {
    %c0_i32 = arith.constant 0 : i32
    %c0_i32_0 = arith.constant 0 : i32
    return %arg0, %c0_i32 : i32, i32
  }
  func.func @transform_2(%arg0: i32) -> (i32, i32) {
    %c0_i32 = arith.constant 0 : i32
    %c0_i32_0 = arith.constant 0 : i32
    return %arg0, %c0_i32 : i32, i32
  }
  func.func @transform_3(%arg0: i32) -> (i32, i32, i32) {
    %c0_i32 = arith.constant 0 : i32
    %c0_i32_0 = arith.constant 0 : i32
    %c0_i32_1 = arith.constant 0 : i32
    return %c0_i32, %arg0, %c0_i32_0 : i32, i32, i32
  }
  func.func @transform_4(%arg0: i32) -> (i32, i32) {
    %c0_i32 = arith.constant 0 : i32
    %c0_i32_0 = arith.constant 0 : i32
    return %arg0, %c0_i32 : i32, i32
  }
  func.func @transform_5(%arg0: i32) -> (i32, i32) {
    %c0_i32 = arith.constant 0 : i32
    %c0_i32_0 = arith.constant 0 : i32
    return %arg0, %c0_i32 : i32, i32
  }
}

</mosaic_0001>

<bundles_post_ra>
// kernel: tpu_custom_call.1
= control target key start
LH: loop header
LB: loop body
LE: loop exit
PB: predicated region body
PF: predicated region fallthrough
CT: control target
= control target key end

     0   :  { %s1239_s0 = inlined_call_operand.hbm [shape: f32[4], index: 0, kind: input, shape index: {}]   ;;  %s1240_s1 = inlined_call_operand.hbm [shape: f32[24,128], index: 1, kind: input, shape index: {}]   ;;  %s1241_s2 = inlined_call_operand.hbm [shape: f32[24,128], index: 2, kind: input, shape index: {}]   ;;  %s1242_s3 = inlined_call_operand.hbm [shape: f32[4,24,128], index: 3, kind: input, shape index: {}]   ;;  %s1243_s4 = inlined_call_operand.hbm [shape: f32[24,128], index: 4, kind: output, shape index: {0}]   ;;  %s1244_s5 = inlined_call_operand.hbm [shape: f32[24,128], index: 5, kind: output, shape index: {1}]  }
   0x1   :  { %1252 = sst [smem:[#allocation20_spill]] %s1240_s1 }
   0x2   :  { %1253 = sst [smem:[#allocation21_spill]] %s1241_s2 }
   0x3   :  { %11 = vsyncpa [#allocation5], 0 }
   0x4   :  { %12 = vsyncpa [#allocation3], 0 }
   0x5   :  { %14 = vsyncpa [#allocation3 + $0x1], 0 }
   0x6   :  { %15 = vsyncpa [#allocation8], 0 }
   0x7   :  { %17 = vsyncpa [#allocation8 + $0x1], 0 }
   0x8   :  { %18 = vsyncpa [#allocation4], 0 }
   0x9   :  { %20 = vsyncpa [#allocation4 + $0x1], 0 }
   0xa   :  { %21 = vsyncpa [#allocation12], 0 }
   0xb   :  { %23 = vsyncpa [#allocation12 + $0x1], 0  ;;  %s918_s18 = smov 0   ;;  %s920_s19 = smov 0  }
   0xc   :  { %s922_s20 = smov 0   ;;  %s924_s21 = smov 0  }
   0xd LB: > { %1254 = sst [smem:[#allocation18_spill]] %s873_s20  ;;  %s939_s22 = sadd.s32 1, %s877_s21   ;;  %s877_s21 = sphi %s924_s21, %s1277_s21   ;;  %s873_s20 = sphi %s922_s20, %s1274_s20   ;;  %s869_s19 = sphi %s920_s19, %s1276_s19   ;;  %s865_s18 = sphi %s918_s18, %s1275_s18  }
   0xe   : > { %s57_s23 = sadd.s32 1, %s873_s20  ;;  %s54_s24 = ssub.s32 %s877_s21, %s939_s22 }
   0xf   : > { %p1245_p0 = scmp.ne.s32.totalorder %s873_s20, %s869_s19  ;;  %p55_p1 = scmp.eq.s32.totalorder %s54_s24, 0 }
  0x10   : > { %p65_p2 = scmp.eq.s32.totalorder %s877_s21, 0  ;;  %p625_p3 = scmp.lt.s32.totalorder %s877_s21, 3 }
  0x11   : > { %s949_s25 = scalar_select %p55_p1, %s873_s20, %s57_s23  }
  0x12   : > { %p66_p4 = por %p65_p2, %p1245_p0  ;;  %s955_s26 = sand.u32 1, %s873_s20  }
  0x13   : > { %1255 = sst [smem:[#allocation19_spill]] %s949_s25  ;;  %s564_s27 = sshll.u32 %s955_s26, 3 }
  0x14   : > { %s959_s28 = sshll.u32 %s877_s21, 7  ;;  %p961_p5 = pnand %p625_p3, %p66_p4 }
  0x15   : > { %s225_s30 = sand.u32 1, %s877_s21   ;;  %s1257_s2 = sld [smem:[#allocation21_spill]] }
  0x16   : > { %s229_s9 = scalar_lea.vmem [#allocation7], %s564_s27  ;;  %s568_s11 = sshll.u32 %s955_s26, 5 }
  0x17   : > { %s236_s10 = sshll.u32 %s229_s9, 4  ;;  %s977_s12 = scalar_lea.sflag [#allocation8], %s225_s30  ;;  %s975_s10 = int_to_ptr.vmem [resolvable:$true] %s236_s10 }
  0x18   : > { %p983_p7 = pneg %p961_p5 }
  0x1b   : > { %s970_s8 = scalar_lea.hbm %s1257_s2, %s959_s28  ;;  %s673_s17 = scalar_lea.hbm %s1257_s2, 384 }
  0x1c   : > { %s668_s13 = scalar_lea.hbm %s970_s8, 128  ;;  %p674_p10 = scmp.lt.u32.totalorder %s970_s8, %s1257_s2 }
  0x1d   : > { %p669_p6 = scmp.ne.s32.totalorder %s970_s8, %s668_s13  ;;  %p675_p11 = scmp.lt.u32.totalorder %s673_s17, %s668_s13 }
  0x1e   : > { %p677_p13 = scmp.lt.u32.totalorder %s668_s13, %s970_s8 }
  0x1f   : > { %p671_p8 = pnand %p983_p7, %p669_p6  ;;  %p676_p12 = por %p675_p11, %p674_p10 }
  0x21   : > { %p672_p9 = pneg %p671_p8  ;;  %p678_p1 = por %p677_p13, %p676_p12 }
  0x23   : > { %p679_p2 = pnand %p678_p1, %p672_p9 }
  0x25   : > { %682 = shalt.err (!%p679_p2)
}
  0x26   : > { %s683_s30 = scalar_lea.vmem %s975_s10, 128  ;;  %s879_s6 = smov [#allocation7]  }
  0x27   : > { %p684_p3 = scmp.ne.s32.totalorder %s975_s10, %s683_s30  ;;  %s688_s7 = sshll.u32 %s879_s6, 4  ;;  %s689_s7 = int_to_ptr.vmem [resolvable:$false] %s688_s7 }
  0x28   : > { %s690_s9 = scalar_lea.vmem %s689_s7, 256  ;;  %p691_p8 = scmp.lt.s32.totalorder %s975_s10, %s689_s7 }
  0x29   : > { %p686_p4 = pnand %p684_p3, %p983_p7  ;;  %p692_p0 = scmp.lt.s32.totalorder %s690_s9, %s683_s30 }
  0x2b   : > { %p687_p6 = pneg %p686_p4  ;;  %p693_p10 = por %p692_p0, %p691_p8 }
  0x2d   : > { %p694_p11 = pnand %p693_p10, %p687_p6 }
  0x2f   : > { %697 = shalt.err (!%p694_p11)
}
  0x30   : > { %613 = dma.hbm_to_vmem [thread:$0]  (!%p961_p5), %s970_s8, 128, %s975_s10, %s977_s12  }
  0x31   : > { %s1011_s16 = scalar_lea.hbm %s1242_s3, %s959_s28  ;;  %s247_s17 = scalar_lea.vmem [#allocation9], %s568_s11 }
  0x32   : > { %s253_s23 = sshll.u32 %s247_s17, 4  ;;  %s1018_s24 = sadd.s32 4294967295, %s877_s21   ;;  %s1015_s23 = int_to_ptr.vmem [resolvable:$true] %s253_s23 }
  0x33   : > { %s560_s30 = sadd.s32 4294967294, %s877_s21   ;;  %p70_p0 = scmp.ne.s32.totalorder %s869_s19, %s865_s18 }
  0x34   : > { %p1247_p9 = scmp.eq.s32.totalorder %s1018_s24, 0  ;;  %p146_p12 = scmp.eq.s32.totalorder %s1018_s24, 2 }
  0x35   : > { %p152_p13 = scmp.eq.s32.totalorder %s560_s30, 2  ;;  %p561_p1 = scmp.ge.s32.totalorder %s877_s21, 1 }
  0x36   : > { %p1028_p2 = por %p1247_p9, %p70_p0  ;;  %p1260_p3 = scmp.ne.s32.totalorder %s873_s20, %s869_s19 }
  0x37   : > { %p1039_p6 = por %p152_p13, %p70_p0  ;;  %p185_p8 = scmp.lt.s32.totalorder %s877_s21, 4 }
  0x38   : > { %s1259_s8 = scalar_select %p1028_p2, 1, 0 }
  0x39   : > { %p1035_p4 = por %p146_p12, %p1260_p3  ;;  %p1044_p10 = pnand %p561_p1, %p185_p8 }
  0x3a   : > { %s1262_s11 = scalar_select %p1039_p6, 1, 0 }
  0x3b   : > { %s1261_s10 = scalar_select %p1035_p4, 1, 0 }
  0x3c   : > { %s1263_s6 = scalar_select %p1044_p10, 1, 0 }
  0x3d   : > { %s1264_s1 = sld [smem:[#allocation20_spill]]  ;;  %p603_p11 = pneg %p1044_p10 }
  0x3e   : > { %s211_s15 = scalar_lea.vmem [#allocation6], %s564_s27  ;;  %s208_s7 = scalar_lea.sflag [#allocation3], %s955_s26 }
  0x3f   : > { %s218_s17 = sshll.u32 %s211_s15, 4  ;;  %p1062_p0 = pnand %p603_p11, %p1247_p9  ;;  %s1058_s17 = int_to_ptr.vmem [resolvable:$true] %s218_s17 }
  0x41   : > { %s1265_s30 = scalar_select %p1062_p0, 1, 0 }
  0x43   : > { %s1052_s13 = scalar_lea.hbm %s1264_s1, %s959_s28  ;;  %s703_s25 = scalar_lea.hbm %s1264_s1, 384 }
  0x44   : > { %s698_s9 = scalar_lea.hbm %s1052_s13, 128  ;;  %p704_p3 = scmp.lt.u32.totalorder %s1052_s13, %s1264_s1 }
  0x45   : > { %p699_p12 = scmp.ne.s32.totalorder %s1052_s13, %s698_s9  ;;  %p705_p8 = scmp.lt.u32.totalorder %s703_s25, %s698_s9 }
  0x46   : > { %p707_p11 = scmp.lt.u32.totalorder %s698_s9, %s1052_s13 }
  0x47   : > { %p701_p13 = pnand %p699_p12, %p983_p7  ;;  %p706_p6 = por %p705_p8, %p704_p3 }
  0x49   : > { %p702_p1 = pneg %p701_p13  ;;  %p708_p9 = por %p707_p11, %p706_p6 }
  0x4b   : > { %p709_p4 = pnand %p708_p9, %p702_p1 }
  0x4d   : > { %712 = shalt.err (!%p709_p4)
}
  0x4e   : > { %s713_s26 = scalar_lea.vmem %s1058_s17, 128  ;;  %s880_s2 = smov [#allocation6]  }
  0x4f   : > { %p714_p12 = scmp.ne.s32.totalorder %s1058_s17, %s713_s26  ;;  %s718_s15 = sshll.u32 %s880_s2, 4  ;;  %s719_s15 = int_to_ptr.vmem [resolvable:$false] %s718_s15 }
  0x50   : > { %s720_s20 = scalar_lea.vmem %s719_s15, 256  ;;  %p721_p10 = scmp.lt.s32.totalorder %s1058_s17, %s719_s15 }
  0x51   : > { %p716_p13 = pnand %p714_p12, %p983_p7  ;;  %p722_p0 = scmp.lt.s32.totalorder %s720_s20, %s713_s26 }
  0x53   : > { %p717_p2 = pneg %p716_p13  ;;  %p723_p3 = por %p722_p0, %p721_p10 }
  0x55   : > { %p724_p8 = pnand %p723_p3, %p717_p2 }
  0x57   : > { %727 = shalt.err (!%p724_p8)
}
  0x58   : > { %610 = dma.hbm_to_vmem [thread:$0]  (!%p961_p5), %s1052_s13, 128, %s1058_s17, %s208_s7  }
  0x59   : > { %s728_s28 = scalar_lea.hbm %s1239_s0, 16  ;;  %p1266_p4 = scmp.ne.s32.totalorder %s1265_s30, 0 }
  0x5a   : > { %p729_p9 = scmp.ne.s32.totalorder %s1239_s0, %s728_s28  ;;  %p735_p2 = scmp.lt.u32.totalorder %s728_s28, %s1239_s0 }
  0x5b   : > { %p730_p6 = pneg %p1266_p4 }
  0x5d   : > { %p731_p1 = pnand %p730_p6, %p729_p9 }
  0x5f   : > { %p732_p10 = pneg %p731_p1 }
  0x61   : > { %p737_p0 = pnand %p735_p2, %p732_p10 }
  0x63   : > { %740 = shalt.err (!%p737_p0)
}
  0x64   : > { %s881_s15 = smov [#allocation2]   ;;  %s741_s1 = scalar_lea.hbm %s1011_s16, 512 }
  0x65   : > { %606 = dma.hbm_to_smem (!%p1266_p4), %s1239_s0, 16, %s881_s15, [#allocation5]  }
  0x66   : > { %p742_p11 = scmp.ne.s32.totalorder %s1011_s16, %s741_s1  ;;  %s746_s25 = scalar_lea.hbm %s1242_s3, 1536 }
  0x67   : > { %p747_p3 = scmp.lt.u32.totalorder %s1011_s16, %s1242_s3  ;;  %p748_p8 = scmp.lt.u32.totalorder %s746_s25, %s741_s1 }
  0x68   : > { %p744_p12 = pnand %p742_p11, %p983_p7  ;;  %p750_p6 = scmp.lt.u32.totalorder %s741_s1, %s1011_s16 }
  0x69   : > { %p749_p9 = por %p748_p8, %p747_p3 }
  0x6a   : > { %p745_p13 = pneg %p744_p12 }
  0x6b   : > { %p751_p1 = por %p750_p6, %p749_p9 }
  0x6d   : > { %p752_p10 = pnand %p751_p1, %p745_p13 }
  0x6f   : > { %755 = shalt.err (!%p752_p10)
}
  0x70   : > { %s756_s28 = scalar_lea.vmem %s1015_s23, 512  ;;  %s882_s27 = smov [#allocation9]  }
  0x71   : > { %p757_p4 = scmp.ne.s32.totalorder %s1015_s23, %s756_s28  ;;  %s761_s26 = sshll.u32 %s882_s27, 4  ;;  %s762_s26 = int_to_ptr.vmem [resolvable:$false] %s761_s26 }
  0x72   : > { %s763_s2 = scalar_lea.vmem %s762_s26, 1024  ;;  %p764_p11 = scmp.lt.s32.totalorder %s1015_s23, %s762_s26 }
  0x73   : > { %p759_p2 = pnand %p757_p4, %p983_p7  ;;  %p765_p12 = scmp.lt.s32.totalorder %s763_s2, %s756_s28 }
  0x75   : > { %p760_p0 = pneg %p759_p2  ;;  %p766_p3 = por %p765_p12, %p764_p11 }
  0x77   : > { %p767_p8 = pnand %p766_p3, %p760_p0 }
  0x79   : > { %770 = shalt.err (!%p767_p8)
}
  0x7a   : > { %s883_s15 = smov 384   ;;  %s884_s13 = smov 128  }
  0x7b   : > { %s885_s17 = smov 8   ;;  %p1267_p7 = scmp.ne.s32.totalorder %s1263_s6, 0 }
  0x7c   : > { %616 = dma.hbm_to_vmem [thread:$0]  (!%p961_p5), %s1011_s16, 512, %s1015_s23, %s977_s12, %s883_s15, %s884_s13, %s885_s17  }
  0x7d   : > { %265 = sbr.rel (%p1267_p7) target bundleno = 210 (0xd2), region = 36  ;;  %p1268_p13 = scmp.eq.s32.totalorder (!%p1267_p7), %s1018_s24, 0 }
  0x84   : > { %844 = dma.done.wait (%p1268_p13), [#allocation5], 16   ;;  %p1269_p9 = pmov %p1268_p13 }
  0x85   : > { %s1133_s14 = sand.u32 1, %s869_s19   ;;  %p1270_p5 = scmp.ne.s32.totalorder %s1259_s8, 0 }
  0x86   : > { %846 = vsyncadd (%p1269_p9), [#allocation5], 4294967280  ;;  %s1136_s1 = sshll.u32 %s1133_s14, 3  ;;  %s272_s29 = scalar_lea.sflag [#allocation3], %s1133_s14 }
  0x87   : > { %s275_s12 = scalar_lea.vmem [#allocation6], %s1136_s1 }
  0x88   : > { %848 = dma.done.wait (%p1270_p5), %s272_s29, 128  }
  0x89   : > { %850 = vsyncadd (%p1270_p5), %s272_s29, 4294967168  ;;  %s280_s16 = sand.u32 1, %s1018_s24   ;;  %s284_s6 = scalar_lea.vmem [#allocation7], %s1136_s1 }
  0x8a   : > { %s281_s23 = scalar_lea.sflag [#allocation8], %s280_s16 }
  0x8b   : > { %852 = dma.done.wait (%p1270_p5), %s281_s23, 640  }
  0x8c   : > { %854 = vsyncadd (%p1270_p5), %s281_s23, 4294966656  ;;  %s574_s7 = sshll.u32 %s1133_s14, 5 }
  0x8d   : > { %s293_s20 = scalar_lea.vmem [#allocation9], %s574_s7 }
  0x8e   : > { %298 = sfence }
  0x8f   : > { %s340_s25 = sld [smem:[#allocation2]]  ;;  %s577_s9 = sld [smem:[#allocation2 + $0x1]]  ;;  %v341_v0 = vld [vmem:[%s293_s20] sm:$0xff]  ;;  %v578_v1 = vld [vmem:[%s293_s20 + $0x8] sm:$0xff]  ;;  %v580_v2 = vld [vmem:[%s293_s20 + $0x10] sm:$0xff] }
  0x90   : > { %s579_s30 = sld [smem:[#allocation2 + $0x2]]  ;;  %s581_s28 = sld [smem:[#allocation2 + $0x3]]  ;;  %v582_v7 = vld [vmem:[%s293_s20 + $0x18] sm:$0xff]  ;;  %v336_v16 = vld [vmem:[%s275_s12] sm:$0xff] }
  0x91   : > { %v337_v17 = vld [vmem:[%s284_s6] sm:$0xff]  ;;  %s328_s8 = scalar_lea.vmem [#allocation10], %s1136_s1  ;;  %s585_s26 = sshll.u32 %s1018_s24, 7 }
  0x92   : > { %v338_v19 = vsub.f32 %v336_v16, %v337_v17  ;;  %s390_s27 = sshll.u32 %s328_s8, 4  ;;  %s335_s2 = scalar_lea.vmem [#allocation11], %s1136_s1  ;;  %s1155_s27 = int_to_ptr.vmem [resolvable:$true] %s390_s27 }
  0x93   : > { %s403_s15 = sshll.u32 %s335_s2, 4  ;;  %s1165_s29 = scalar_lea.hbm %s1243_s4, %s585_s26  ;;  %s1167_s15 = int_to_ptr.vmem [resolvable:$true] %s403_s15 }
  0x94   : > { %v339_v20 = vand.u32 2147483647, %v338_v19  ;;  %s372_s12 = scalar_lea.sflag [#allocation4], %s1133_s14  ;;  %s771_s16 = scalar_lea.vmem %s1155_s27, 128 }
  0x95   : > { %v342_v3 = vstv %s340_s25  ;;  %v347_v5 = vstv %s577_s9  ;;  %p772_p6 = scmp.ne.s32.totalorder %s1155_s27, %s771_s16  ;;  %p1271_p1 = scmp.ne.s32.totalorder %s1261_s10, 0 }
  0x96   : > { %v343_v4 = vmul.f32 %v342_v3, %v341_v0  ;;  %v353_v6 = vstv %s579_s30  ;;  %v348_v8 = vmul.f32 %v578_v1, %v347_v5  ;;  %v359_v10 = vstv %s581_s28  ;;  %s886_s23 = smov [#allocation10]  }
  0x97   : > { %v354_v9 = vmul.f32 %v580_v2, %v353_v6  ;;  %v360_v12 = vmul.f32 %v582_v7, %v359_v10  ;;  %p773_p10 = pnand %p772_p6, %p1271_p1  ;;  %s775_s6 = sshll.u32 %s886_s23, 4  ;;  %s776_s6 = int_to_ptr.vmem [resolvable:$false] %s775_s6 }
  0x98   : > { %v349_v11 = vadd.f32 %v348_v8, %v343_v4  ;;  %s777_s7 = scalar_lea.vmem %s776_s6, 256  ;;  %p778_p2 = scmp.lt.s32.totalorder %s1155_s27, %s776_s6 }
  0x99   : > { %p774_p4 = pneg %p773_p10  ;;  %p779_p0 = scmp.lt.s32.totalorder %s777_s7, %s771_s16 }
  0x9a   : > { %v355_v13 = vadd.f32 %v354_v9, %v349_v11 }
  0x9b   : > { %p780_p11 = por %p779_p0, %p778_p2 }
  0x9c   : > { %v361_v14 = vadd.f32 %v360_v12, %v355_v13 }
  0x9d   : > { %p781_p12 = pnand %p780_p11, %p774_p4 }
  0x9e   : > { %v362_v15 = vmax.f32 %v361_v14, 1e-07 }
  0xa0   : > { %664 = vrcp.f32 %v362_v15  ;;  %v366_v18 = vmul.f32 2.0, %v362_v15 }
  0xa2   : > { %666 = vlog2.f32 %v366_v18 }
  0xaa   : > { %v665_v21 = vpop.eup %664 }
  0xab   : > { %v364_v22 = vmul.f32 %v665_v21, %v339_v20 }
  0xac   : > { %v667_v23 = vpop.eup %666 }
  0xad   : > { %365 = vst [vmem:[%s328_s8] sm:$0xff] %v364_v22  ;;  %v368_v24 = vmul.f32 0.6931472, %v667_v23 }
  0xae   : > { %784 = shalt.err (!%p781_p12)
}
  0xaf   : > { %s785_s20 = scalar_lea.hbm %s1165_s29, 128  ;;  %s789_s30 = scalar_lea.hbm %s1243_s4, 384 }
  0xb0   : > { %p786_p3 = scmp.ne.s32.totalorder %s1165_s29, %s785_s20  ;;  %p790_p13 = scmp.lt.u32.totalorder %s1165_s29, %s1243_s4 }
  0xb1   : > { %p791_p9 = scmp.lt.u32.totalorder %s789_s30, %s785_s20  ;;  %p793_p6 = scmp.lt.u32.totalorder %s785_s20, %s1165_s29 }
  0xb2   : > { %p787_p8 = pnand %p786_p3, %p1271_p1 }
  0xb3   : > { %p792_p5 = por %p791_p9, %p790_p13 }
  0xb4   : > { %p788_p7 = pneg %p787_p8 }
  0xb5   : > { %p794_p10 = por %p793_p6, %p792_p5 }
  0xb7   : > { %p795_p4 = pnand %p794_p10, %p788_p7 }
  0xb9   : > { %798 = shalt.err (!%p795_p4)
}
  0xba   : > { %599 = dma.vmem_to_hbm [thread:$0]  (%p1271_p1), %s1155_s27, 128, %s1165_s29, %s372_s12   ;;  %v369_v25 = vadd.f32 %v368_v24, %v364_v22 }
  0xbb   : > { %s1196_s16 = scalar_lea.hbm %s1244_s5, %s585_s26  ;;  %s377_s23 = scalar_lea.sflag [#allocation12], %s1133_s14 }
  0xbc   : > { %370 = vst [vmem:[%s335_s2] sm:$0xff] %v369_v25  ;;  %s799_s6 = scalar_lea.vmem %s1167_s15, 128  ;;  %s887_s7 = smov [#allocation11]  }
  0xbd   : > { %p800_p2 = scmp.ne.s32.totalorder %s1167_s15, %s799_s6  ;;  %s803_s20 = sshll.u32 %s887_s7, 4  ;;  %s804_s20 = int_to_ptr.vmem [resolvable:$false] %s803_s20 }
  0xbe   : > { %s805_s25 = scalar_lea.vmem %s804_s20, 256  ;;  %p806_p12 = scmp.lt.s32.totalorder %s1167_s15, %s804_s20 }
  0xbf   : > { %p801_p0 = pnand %p800_p2, %p1271_p1  ;;  %p807_p3 = scmp.lt.s32.totalorder %s805_s25, %s799_s6 }
  0xc1   : > { %p802_p11 = pneg %p801_p0  ;;  %p808_p8 = por %p807_p3, %p806_p12 }
  0xc3   : > { %p809_p7 = pnand %p808_p8, %p802_p11 }
  0xc5   : > { %812 = shalt.err (!%p809_p7)
}
  0xc6   : > { %s813_s24 = scalar_lea.hbm %s1196_s16, 128  ;;  %s817_s27 = scalar_lea.hbm %s1244_s5, 384 }
  0xc7   : > { %p814_p13 = scmp.ne.s32.totalorder %s1196_s16, %s813_s24  ;;  %p818_p6 = scmp.lt.u32.totalorder %s1196_s16, %s1244_s5 }
  0xc8   : > { %p819_p10 = scmp.lt.u32.totalorder %s817_s27, %s813_s24  ;;  %p821_p2 = scmp.lt.u32.totalorder %s813_s24, %s1196_s16 }
  0xc9   : > { %p815_p9 = pnand %p814_p13, %p1271_p1 }
  0xca   : > { %p820_p4 = por %p819_p10, %p818_p6 }
  0xcb   : > { %p816_p5 = pneg %p815_p9 }
  0xcc   : > { %p822_p0 = por %p821_p2, %p820_p4 }
  0xce   : > { %p823_p11 = pnand %p822_p0, %p816_p5 }
  0xd0   : > { %826 = shalt.err (!%p823_p11)
}
  0xd1   : > { %600 = dma.vmem_to_hbm [thread:$0]  (%p1271_p1), %s1167_s15, 128, %s1196_s16, %s377_s23  }
  0xd2 PF: > { %p627_p12 = scmp.ge.s32.totalorder %s877_s21, 2  ;;  %s415_s29 = sand.u32 1, %s865_s18  }
  0xd3   : > { %p1272_p3 = scmp.ne.s32.totalorder %s1262_s11, 0  ;;  %s416_s12 = scalar_lea.sflag [#allocation4], %s415_s29 }
  0xd5   : > { %p618_p8 = pnand %p627_p12, %p1272_p3 }
  0xd7   : > { %856 = dma.done.wait (!%p618_p8), %s416_s12, 128  }
  0xd8   : > { %858 = vsyncadd (!%p618_p8), %s416_s12, 4294967168  ;;  %s425_s9 = scalar_lea.sflag [#allocation12], %s415_s29 }
  0xd9   : > { %860 = dma.done.wait (!%p618_p8), %s425_s9, 128  }
  0xda   : > { %862 = vsyncadd (!%p618_p8), %s425_s9, 4294967168  ;;  %s1273_s10 = sld [smem:[#allocation18_spill]]  ;;  %s1274_s20 = sld [smem:[#allocation19_spill]] }
  0xdb   : > { %p26_p1 = scmp.ge.s32.totalorder %s939_s22, 5   ;;  %s1275_s18 = smov %s869_s19 }
  0xdc   : > { %s1277_s21 = smov %s939_s22 }
  0xdd   :  { %28 = sbr.rel (!%p26_p1) target bundleno = 13 (0xd), region = 130 }
  0xe0   : > { %s1276_s19 = smov %s1273_s10 }
  0xe4   :  { %430 = vsyncpa [#allocation3], 1 }
  0xe5   :  { %432 = vsyncpa [#allocation3 + $0x1], 1 }
  0xe6   :  { %433 = vsyncpa [#allocation8], 1 }
  0xe7   :  { %435 = vsyncpa [#allocation8 + $0x1], 1 }
  0xe8   :  { %436 = vsyncpa [#allocation4], 1 }
  0xe9   :  { %438 = vsyncpa [#allocation4 + $0x1], 1 }
  0xea   :  { %439 = vsyncpa [#allocation12], 1 }
  0xeb   :  { %441 = vsyncpa [#allocation12 + $0x1], 1 }
  0xec   :  { %442 = vsyncpa [#allocation5], 1 }
  0xed   :  { %444 = vsyncpa [#allocation5 + $0x1], 1 }

</bundles_post_ra>
